<compile_context>
chip_gen: v6e
topology: v6e:2x2x1
jax: 0.10.0
libtpu: 0.0.40
codegen_flags: <defaults>
</compile_context>

<pallas_src>
import functools

import jax
import jax.numpy as jnp
from jax.experimental import pallas as pl
from jax.experimental.pallas import tpu as pltpu

_EPS = 1e-07
_LANES = 128
_SUBLANES = 8
_MAX_TILE_ROWS = 4096  # (4096, 128) f32 = 2 MiB per input tile


def _round_up(x, m):
    return ((x + m - 1) // m) * m


def _bce_kernel(yt_ref, yp_ref, out_ref, acc_ref, *,
                total_count, tile_rows, steps_per_split, needs_mask):
    p = pl.program_id(0)   # parallel split (exposes v7x's 2 TensorCores)
    j = pl.program_id(1)   # sequential reduction step within the split

    @pl.when(j == 0)
    def _init():
        acc_ref[...] = jnp.zeros_like(acc_ref)

    yt = yt_ref[...].astype(jnp.float32)
    yp = yp_ref[...].astype(jnp.float32)

    # elementwise BCE (VPU + EUP for the logs); kept in the general soft-label
    # form to match compute_vec exactly.
    loss = -yt * jnp.log(yp + _EPS) - (1.0 - yt) * jnp.log(1.0 - yp + _EPS)

    if needs_mask:
        # Zero the contribution of padded elements so the mean over the true
        # element count is exact.  int32 indices are fine for this module's
        # sizes (max_size_memory_safe = 5e8 elements < 2**31).
        r = jax.lax.broadcasted_iota(jnp.int32, loss.shape, 0)
        c = jax.lax.broadcasted_iota(jnp.int32, loss.shape, 1)
        block = p * steps_per_split + j
        elem_idx = (block * tile_rows + r) * _LANES + c
        loss = jnp.where(elem_idx < total_count, loss, 0.0)

    # Fold the (tile_rows,128) tile into the (8,128) accumulator with pure
    # vreg-aligned vector adds (no cross-lane/XLU reduce in the hot loop).
    acc_ref[...] += loss.reshape(
        tile_rows // _SUBLANES, _SUBLANES, _LANES).sum(axis=0)

    @pl.when(j == pl.num_programs(1) - 1)
    def _finalize():
        out_ref[...] = acc_ref[...]


def binary_cross_entropy(y_true, y_pred):
    """mean BCE over all elements; y_true/y_pred same shape (e.g. NCHW)."""
    assert y_true.shape == y_pred.shape
    total = int(y_true.size)

    rows_raw = pl.cdiv(total, _LANES)
    tile_rows = min(_MAX_TILE_ROWS, _round_up(rows_raw, _SUBLANES))
    steps_total = pl.cdiv(rows_raw, tile_rows)
    num_splits = 2 if steps_total >= 2 else 1
    steps_per_split = pl.cdiv(steps_total, num_splits)
    padded_rows = num_splits * steps_per_split * tile_rows
    padded_total = padded_rows * _LANES
    needs_mask = padded_total != total

    yt_flat = jnp.ravel(y_true)
    yp_flat = jnp.ravel(y_pred)
    pad = padded_total - total
    if pad:
        yt_flat = jnp.pad(yt_flat, (0, pad))
        yp_flat = jnp.pad(yp_flat, (0, pad))
    yt2 = yt_flat.reshape(padded_rows, _LANES)
    yp2 = yp_flat.reshape(padded_rows, _LANES)

    kernel = functools.partial(
        _bce_kernel, total_count=total, tile_rows=tile_rows,
        steps_per_split=steps_per_split, needs_mask=needs_mask)

    in_map = lambda p, j: (p * steps_per_split + j, 0)

    partial_sums = pl.pallas_call(
        kernel,
        out_shape=jax.ShapeDtypeStruct((num_splits * _SUBLANES, _LANES),
                                       jnp.float32),
        grid_spec=pltpu.PrefetchScalarGridSpec(
            num_scalar_prefetch=0,
            grid=(num_splits, steps_per_split),
            in_specs=[
                pl.BlockSpec((tile_rows, _LANES), in_map),
                pl.BlockSpec((tile_rows, _LANES), in_map),
            ],
            out_specs=pl.BlockSpec((_SUBLANES, _LANES), lambda p, j: (p, 0)),
            scratch_shapes=[pltpu.VMEM((_SUBLANES, _LANES), jnp.float32)],
        ),
        compiler_params=pltpu.CompilerParams(
            dimension_semantics=("parallel", "arbitrary"),
        ),
    )(yt2, yp2)

    # Tiny final reduce (<= 2*8*128 f32) + mean in the wrapper.
    return jnp.sum(partial_sums) / jnp.float32(total)


def _reference(y_true, y_pred):
    return jnp.mean(
        -y_true * jnp.log(y_pred + _EPS)
        - (1.0 - y_true) * jnp.log(1.0 - y_pred + _EPS)
    )


if __name__ == "__main__":
    key = jax.random.PRNGKey(0)
    k1, k2, k3, k4 = jax.random.split(key, 4)

    # small NCHW shape: batch=2, channels=4, spatial=16x16
    shape = (2, 4, 16, 16)
    y_pred = jax.random.uniform(k1, shape, dtype=jnp.float32,
                                minval=0.01, maxval=0.99)
    y_true = (jax.random.uniform(k2, shape, dtype=jnp.float32) > 0.5).astype(
        jnp.float32)

    loss = binary_cross_entropy(y_true, y_pred)
    loss = jax.block_until_ready(loss)
    ref = _reference(y_true, y_pred)
    assert jnp.allclose(loss, ref, rtol=1e-5, atol=1e-6), (loss, ref)

    # odd, non-(8*128)-divisible shape exercises the pad + mask path
    shape2 = (2, 3, 7, 9)
    y_pred2 = jax.random.uniform(k3, shape2, dtype=jnp.float32,
                                 minval=0.01, maxval=0.99)
    y_true2 = (jax.random.uniform(k4, shape2, dtype=jnp.float32) > 0.5).astype(
        jnp.float32)
    loss2 = jax.block_until_ready(binary_cross_entropy(y_true2, y_pred2))
    ref2 = _reference(y_true2, y_pred2)
    assert jnp.allclose(loss2, ref2, rtol=1e-5, atol=1e-6), (loss2, ref2)

    print("KERNEL_OK")
</pallas_src>

<mosaic_0001>
module attributes {stable_mosaic.version = 11 : i64} {
  func.func @_bce_kernel(%arg0: i32, %arg1: i32, %arg2: memref<16x128xf32, #tpu.memory_space<vmem>>, %arg3: memref<16x128xf32, #tpu.memory_space<vmem>>, %arg4: memref<8x128xf32, #tpu.memory_space<vmem>>, %arg5: memref<8x128xf32, #tpu.memory_space<vmem>>) attributes {dimension_semantics = [#tpu.dimension_semantics<parallel>, #tpu.dimension_semantics<arbitrary>], iteration_bounds = array<i64: 1, 1>, scalar_prefetch = 0 : i64, scratch_operands = 1 : i64, tpu.core_type = #tpu.core_type<tc>, window_params = [{transform_indices = @transform_0, window_bounds = array<i64: 16, 128>}, {transform_indices = @transform_1, window_bounds = array<i64: 16, 128>}, {transform_indices = @transform_2, window_bounds = array<i64: 8, 128>}]} {
    %c0_i32 = arith.constant 0 : i32
    %0 = arith.cmpi eq, %arg1, %c0_i32 : i32
    %1 = arith.extui %0 : i1 to i32
    %c0_i32_0 = arith.constant 0 : i32
    %2 = arith.cmpi ne, %1, %c0_i32_0 : i32
    scf.if %2 {
      %cst_15 = arith.constant 0.000000e+00 : f32
      %28 = vector.broadcast %cst_15 : f32 to vector<8x128xf32>
      %c0_16 = arith.constant 0 : index
      %c0_17 = arith.constant 0 : index
      %29 = vector.load %arg5[%c0_16, %c0_17] : memref<8x128xf32, #tpu.memory_space<vmem>>, vector<8x128xf32>
      tpu.vector_store %arg5[%c0_16, %c0_17], %28 {strides = array<i32>} : memref<8x128xf32, #tpu.memory_space<vmem>>, vector<8x128xf32>,
    } else {
    }
    %c0 = arith.constant 0 : index
    %c0_1 = arith.constant 0 : index
    %3 = vector.load %arg2[%c0, %c0_1] : memref<16x128xf32, #tpu.memory_space<vmem>>, vector<16x128xf32>
    %c0_2 = arith.constant 0 : index
    %c0_3 = arith.constant 0 : index
    %4 = vector.load %arg3[%c0_2, %c0_3] : memref<16x128xf32, #tpu.memory_space<vmem>>, vector<16x128xf32>
    %cst = arith.constant 0.000000e+00 : f32
    %5 = vector.broadcast %cst : f32 to vector<16x128xf32>
    %6 = arith.subf %5, %3 : vector<16x128xf32>
    %cst_4 = arith.constant 1.000000e-07 : f32
    %7 = vector.broadcast %cst_4 : f32 to vector<16x128xf32>
    %8 = arith.addf %4, %7 : vector<16x128xf32>
    %9 = math.log %8 : vector<16x128xf32>
    %10 = arith.mulf %6, %9 : vector<16x128xf32>
    %cst_5 = arith.constant 1.000000e+00 : f32
    %11 = vector.broadcast %cst_5 : f32 to vector<16x128xf32>
    %12 = arith.subf %11, %3 : vector<16x128xf32>
    %cst_6 = arith.constant 1.000000e+00 : f32
    %13 = vector.broadcast %cst_6 : f32 to vector<16x128xf32>
    %14 = arith.subf %13, %4 : vector<16x128xf32>
    %cst_7 = arith.constant 1.000000e-07 : f32
    %15 = vector.broadcast %cst_7 : f32 to vector<16x128xf32>
    %16 = arith.addf %14, %15 : vector<16x128xf32>
    %17 = math.log %16 : vector<16x128xf32>
    %18 = arith.mulf %12, %17 : vector<16x128xf32>
    %19 = arith.subf %10, %18 : vector<16x128xf32>
    %c0_8 = arith.constant 0 : index
    %c0_9 = arith.constant 0 : index
    %20 = vector.load %arg5[%c0_8, %c0_9] : memref<8x128xf32, #tpu.memory_space<vmem>>, vector<8x128xf32>
    %21 = vector.shape_cast %19 : vector<16x128xf32> to vector<2x8x128xf32>
    %cst_10 = arith.constant dense<0.000000e+00> : vector<8x128xf32>
    %22 = vector.multi_reduction <add>, %21, %cst_10 [0] : vector<2x8x128xf32> to vector<8x128xf32>
    %23 = arith.addf %20, %22 : vector<8x128xf32>
    %c0_11 = arith.constant 0 : index
    %c0_12 = arith.constant 0 : index
    %24 = vector.load %arg5[%c0_11, %c0_12] : memref<8x128xf32, #tpu.memory_space<vmem>>, vector<8x128xf32>
    tpu.vector_store %arg5[%c0_11, %c0_12], %23 {strides = array<i32>} : memref<8x128xf32, #tpu.memory_space<vmem>>, vector<8x128xf32>,
    %c0_i32_13 = arith.constant 0 : i32
    %25 = arith.cmpi eq, %arg1, %c0_i32_13 : i32
    %26 = arith.extui %25 : i1 to i32
    %c0_i32_14 = arith.constant 0 : i32
    %27 = arith.cmpi ne, %26, %c0_i32_14 : i32
    scf.if %27 {
      %c0_15 = arith.constant 0 : index
      %c0_16 = arith.constant 0 : index
      %28 = vector.load %arg5[%c0_15, %c0_16] : memref<8x128xf32, #tpu.memory_space<vmem>>, vector<8x128xf32>
      %c0_17 = arith.constant 0 : index
      %c0_18 = arith.constant 0 : index
      %29 = vector.load %arg4[%c0_17, %c0_18] : memref<8x128xf32, #tpu.memory_space<vmem>>, vector<8x128xf32>
      tpu.vector_store %arg4[%c0_17, %c0_18], %28 {strides = array<i32>} : memref<8x128xf32, #tpu.memory_space<vmem>>, vector<8x128xf32>,
    } else {
    }
    return
  }
  func.func @transform_0(%arg0: i32, %arg1: i32) -> (i32, i32) {
    %c1_i32 = arith.constant 1 : i32
    %0 = arith.muli %arg0, %c1_i32 : i32
    %1 = arith.addi %0, %arg1 : i32
    %c0_i32 = arith.constant 0 : i32
    %c0_i32_0 = arith.constant 0 : i32
    return %1, %c0_i32 : i32, i32
  }
  func.func @transform_1(%arg0: i32, %arg1: i32) -> (i32, i32) {
    %c1_i32 = arith.constant 1 : i32
    %0 = arith.muli %arg0, %c1_i32 : i32
    %1 = arith.addi %0, %arg1 : i32
    %c0_i32 = arith.constant 0 : i32
    %c0_i32_0 = arith.constant 0 : i32
    return %1, %c0_i32 : i32, i32
  }
  func.func @transform_2(%arg0: i32, %arg1: i32) -> (i32, i32) {
    %c0_i32 = arith.constant 0 : i32
    %c0_i32_0 = arith.constant 0 : i32
    return %arg0, %c0_i32 : i32, i32
  }
}

</mosaic_0001>

<bundles_post_ra>
// kernel: tpu_custom_call.1
= control target key start
LH: loop header
LB: loop body
LE: loop exit
PB: predicated region body
PF: predicated region fallthrough
CT: control target
= control target key end

     0   :  { %7 = vsyncpa [#allocation4], 0  ;;  %s218_s0 = inlined_call_operand.hbm [shape: f32[16,128], index: 0, kind: input, shape index: {}]   ;;  %s219_s1 = inlined_call_operand.hbm [shape: f32[16,128], index: 1, kind: input, shape index: {}]   ;;  %s220_s2 = inlined_call_operand.hbm [shape: f32[8,128], index: 2, kind: output, shape index: {}]  }
   0x1   :  { %8 = vsyncpa [#allocation7], 0 }
   0x2   :  { %9 = vsyncpa [#allocation5], 0  ;;  %s189_s9 = smov [#allocation3]  }
   0x3   :  { %s19_s10 = sshll.u32 %s189_s9, 4  ;;  %s20_s10 = int_to_ptr.vmem [resolvable:$true] %s19_s10 }
   0x4   :  { %s131_s11 = scalar_lea.vmem %s20_s10, 256  ;;  %p136_p1 = scmp.lt.s32.totalorder %s20_s10, %s20_s10 }
   0x5   :  { %p132_p0 = scmp.ne.s32.totalorder %s20_s10, %s131_s11  ;;  %p137_p2 = scmp.lt.s32.totalorder %s131_s11, %s131_s11 }
   0x7   :  { %p138_p3 = por %p137_p2, %p136_p1 }
   0x9   :  { %p139_p4 = pnand %p138_p3, %p132_p0 }
   0xb   :  { %142 = shalt.err (!%p139_p4)
}
   0xc   :  { %s190_s12 = smov 128   ;;  %s191_s13 = smov 8  }
   0xd   :  { %25 = dma.hbm_to_vmem [thread:$0]  %s218_s0, 256, %s20_s10, [#allocation4], %s190_s12, %s190_s12, %s191_s13  }
   0xe   :  { %s192_s16 = smov [#allocation6]  }
   0xf   :  { %s35_s17 = sshll.u32 %s192_s16, 4  ;;  %s36_s17 = int_to_ptr.vmem [resolvable:$true] %s35_s17 }
  0x10   :  { %s151_s18 = scalar_lea.vmem %s36_s17, 256  ;;  %p156_p6 = scmp.lt.s32.totalorder %s36_s17, %s36_s17 }
  0x11   :  { %p152_p5 = scmp.ne.s32.totalorder %s36_s17, %s151_s18  ;;  %p157_p7 = scmp.lt.s32.totalorder %s151_s18, %s151_s18 }
  0x13   :  { %p158_p8 = por %p157_p7, %p156_p6 }
  0x15   :  { %p159_p9 = pnand %p158_p8, %p152_p5 }
  0x17   :  { %162 = shalt.err (!%p159_p9)
}
  0x18   :  { %41 = dma.hbm_to_vmem [thread:$0]  %s219_s1, 256, %s36_s17, [#allocation7], %s190_s12, %s190_s12, %s191_s13  }
  0x19   :  { %183 = dma.done.wait [#allocation4], 256  }
  0x1a   :  { %184 = vsyncadd [#allocation4], 4294967040 }
  0x1b   :  { %185 = dma.done.wait [#allocation7], 256  }
  0x1c   :  { %186 = vsyncadd [#allocation7], 4294967040  ;;  %v59_v0 = vld [vmem:[#allocation6] sm:$0xff]  ;;  %v60_v1 = vld [vmem:[#allocation6 + $0x8] sm:$0xff]  ;;  %s193_s0 = smov [#allocation8]  }
  0x1d   :  { %v63_v2 = vadd.f32 1e-07, %v59_v0  ;;  %v64_v3 = vadd.f32 1e-07, %v60_v1  ;;  %v73_v4 = vsub.f32 1.0, %v59_v0  ;;  %v74_v5 = vsub.f32 1.0, %v60_v1 }
  0x1e   :  { %v57_v8 = vld [vmem:[#allocation3] sm:$0xff]  ;;  %v58_v9 = vld [vmem:[#allocation3 + $0x8] sm:$0xff]  ;;  %s100_s1 = sshll.u32 %s193_s0, 4  ;;  %s101_s1 = int_to_ptr.vmem [resolvable:$true] %s100_s1 }
  0x1f   :  { %115 = vlog2.f32 %v63_v2  ;;  %v75_v6 = vadd.f32 1e-07, %v73_v4  ;;  %v76_v7 = vadd.f32 1e-07, %v74_v5  ;;  %v61_v11 = vsub.f32 0.0, %v57_v8  ;;  %s163_s21 = scalar_lea.vmem %s101_s1, 128  ;;  %p168_p11 = scmp.lt.s32.totalorder %s101_s1, %s101_s1 }
  0x20   :  { %117 = vlog2.f32 %v64_v3  ;;  %v62_v13 = vsub.f32 0.0, %v58_v9  ;;  %v71_v16 = vsub.f32 1.0, %v57_v8  ;;  %v72_v18 = vsub.f32 1.0, %v58_v9  ;;  %p164_p10 = scmp.ne.s32.totalorder %s101_s1, %s163_s21  ;;  %p169_p12 = scmp.lt.s32.totalorder %s163_s21, %s163_s21 }
  0x21   :  { %119 = vlog2.f32 %v75_v6 }
  0x22   :  { %121 = vlog2.f32 %v76_v7  ;;  %p170_p13 = por %p169_p12, %p168_p11 }
  0x24   :  { %p171_p0 = pnand %p170_p13, %p164_p10 }
  0x2c   :  { %v116_v10 = vpop.eup %115 }
  0x2d   :  { %v118_v12 = vpop.eup %117  ;;  %v66_v14 = vmul.f32 0.6931472, %v116_v10 }
  0x2e   :  { %v68_v15 = vmul.f32 0.6931472, %v118_v12  ;;  %v120_v17 = vpop.eup %119 }
  0x2f   :  { %v122_v19 = vpop.eup %121  ;;  %v69_v20 = vmul.f32 %v66_v14, %v61_v11  ;;  %v78_v21 = vmul.f32 0.6931472, %v120_v17 }
  0x30   :  { %v70_v22 = vmul.f32 %v68_v15, %v62_v13  ;;  %v80_v23 = vmul.f32 0.6931472, %v122_v19 }
  0x31   :  { %v81_v24 = vmul.f32 %v78_v21, %v71_v16 }
  0x32   :  { %v82_v25 = vmul.f32 %v80_v23, %v72_v18 }
  0x33   :  { %v83_v26 = vsub.f32 %v69_v20, %v81_v24 }
  0x34   :  { %v84_v27 = vsub.f32 %v70_v22, %v82_v25 }
  0x36   :  { %v86_v28 = vadd.f32 %v84_v27, %v83_v26 }
  0x38   :  { %93 = vst [vmem:[#allocation8] sm:$0xff] %v86_v28 }
  0x39   :  { %174 = shalt.err (!%p171_p0)
}
  0x3a   :  { %103 = dma.vmem_to_hbm [thread:$0]  %s101_s1, 128, %s220_s2, [#allocation5]  }
  0x3b   :  { %187 = dma.done.wait [#allocation5], 128  }
  0x3c   :  { %188 = vsyncadd [#allocation5], 4294967168 }
  0x3d   :  { %107 = vsyncpa [#allocation4], 1 }
  0x3e   :  { %108 = vsyncpa [#allocation7], 1 }
  0x3f   :  { %109 = vsyncpa [#allocation5], 1 }

</bundles_post_ra>
